<compile_context>
chip_gen: v6e
topology: v6e:2x2x1
jax: 0.10.0
libtpu: 0.0.40
codegen_flags: <defaults>
</compile_context>

<pallas_src>
import math

import jax
import jax.numpy as jnp
from jax import lax
from jax.experimental import pallas as pl
from jax.experimental.pallas import tpu as pltpu


# ---------------------------------------------------------------------------
# Pallas kernel: fully-fused L2DClassifier forward (embeddings + MLP stack)
# ---------------------------------------------------------------------------
def _make_fused_kernel(cat_offsets, total_cats, num_extra_layers):
    """Build a kernel for a fixed architecture.

    Ref order:
      x_cat (int32), x_num,
      Wc1 (total_cats, H1), Wn1 (D_num, H1), b1 (1, H1),
      [W_l, b_l] * num_extra_layers,
      W_out, b_out,
      o_ref
    All BatchNorm affines are already folded into the W/b tensors.
    """
    n_cat = len(cat_offsets)

    def kernel(*refs):
        x_cat_ref, x_num_ref, wc1_ref, wn1_ref, b1_ref = refs[:5]
        o_ref = refs[-1]
        rest = refs[5:-1]

        tb = x_cat_ref.shape[0]

        # --- fused embedding lookup: multi-hot @ (pre-folded tables) --------
        idx = x_cat_ref[...]                                   # (TB, n_cat) i32
        lanes = lax.broadcasted_iota(jnp.int32, (tb, total_cats), 1)
        mh = jnp.zeros((tb, total_cats), jnp.float32)
        for c in range(n_cat):
            idx_c = idx[:, c:c + 1] + cat_offsets[c]           # (TB, 1)
            mh = mh + (lanes == idx_c).astype(jnp.float32)

        # --- layer 1 (input BN + embedding matmul folded in) ----------------
        h = jnp.dot(mh, wc1_ref[...], preferred_element_type=jnp.float32)
        h = h + jnp.dot(x_num_ref[...].astype(jnp.float32), wn1_ref[...],
                        preferred_element_type=jnp.float32)
        h = jnp.maximum(h + b1_ref[...], 0.0)

        # --- remaining hidden layers (previous layer's BN folded in) --------
        p = 0
        for _ in range(num_extra_layers):
            w_ref, b_ref = rest[p], rest[p + 1]
            p += 2
            h = jnp.dot(h, w_ref[...], preferred_element_type=jnp.float32)
            h = jnp.maximum(h + b_ref[...], 0.0)

        # --- output Linear (last BN folded in) + LogSoftmax(dim=1) ----------
        w_out_ref, b_out_ref = rest[p], rest[p + 1]
        logits = jnp.dot(h, w_out_ref[...], preferred_element_type=jnp.float32)
        logits = logits + b_out_ref[...]

        m = jnp.max(logits, axis=-1, keepdims=True)
        z = logits - m
        lse = jnp.log(jnp.sum(jnp.exp(z), axis=-1, keepdims=True))
        o_ref[...] = (z - lse).astype(o_ref.dtype)

    return kernel


def _round_up(x, m):
    return ((x + m - 1) // m) * m


def l2d_forward_pallas(x_categorical, x_numerical, folded, *, tb=None):
    """Fused L2DClassifier forward on TPU.

    x_categorical : (B, n_cat) int32 raw category ids
    x_numerical   : (B, D_num) float32
    folded        : output of fold_params()
    """
    (wc1, wn1, b1, extra, w_out, b_out, cat_offsets, total_cats) = folded

    b = x_categorical.shape[0]
    n_cat = x_categorical.shape[1]
    d_num = x_numerical.shape[1]
    num_labels = w_out.shape[1]

    if tb is None:
        tb = min(256, _round_up(b, 8))      # batch tile (multiple of 8 sublanes)
    b_pad = _round_up(b, tb)
    if b_pad != b:
        x_categorical = jnp.pad(x_categorical, ((0, b_pad - b), (0, 0)))
        x_numerical = jnp.pad(x_numerical, ((0, b_pad - b), (0, 0)))

    kernel = _make_fused_kernel(tuple(int(o) for o in cat_offsets),
                                int(total_cats), len(extra))

    weights = [wc1, wn1, b1]
    for (w, bb) in extra:
        weights += [w, bb]
    weights += [w_out, b_out]

    grid = (pl.cdiv(b_pad, tb),)

    def batch_spec(width):
        return pl.BlockSpec((tb, width), lambda i: (i, 0))

    def resident(arr):
        return pl.BlockSpec(arr.shape, lambda i: (0, 0))   # stays in VMEM

    in_specs = ([batch_spec(n_cat), batch_spec(d_num)]
                + [resident(w) for w in weights])
    out_specs = pl.BlockSpec((tb, num_labels), lambda i: (i, 0))

    out = pl.pallas_call(
        kernel,
        grid=grid,
        in_specs=in_specs,
        out_specs=out_specs,
        out_shape=jax.ShapeDtypeStruct((b_pad, num_labels), jnp.float32),
        compiler_params=pltpu.CompilerParams(
            # batch tiles are independent -> megacore sharding on v7x
            dimension_semantics=("parallel",),
        ),
    )(x_categorical, x_numerical, *weights)
    return out[:b]


# ---------------------------------------------------------------------------
# Parameter construction (mirrors L2DClassifier.__init__, eval-mode stats)
# ---------------------------------------------------------------------------
def halved_ceiling_fn(num_categories_per_col, upper_bound=50):
    return [(n, min(upper_bound, (n + 1) // 2)) for n in num_categories_per_col]


def init_raw_params(key, cat_col_sizes, num_numerical_cols, layers, num_labels):
    """Raw (unfolded) parameters: embeddings, BN stats, Linear weights.

    Linear weights are stored as (in, out) (transpose of the PyTorch layout).
    """
    emb_sizes = halved_ceiling_fn(cat_col_sizes)
    keys = iter(jax.random.split(key, 8 + 2 * len(emb_sizes) + 8 * len(layers)))

    emb_tables = [jax.random.normal(next(keys), (ni, nf), jnp.float32)
                  for ni, nf in emb_sizes]

    dn = num_numerical_cols
    bn_num = (
        1.0 + 0.1 * jax.random.normal(next(keys), (dn,), jnp.float32),   # gamma
        0.1 * jax.random.normal(next(keys), (dn,), jnp.float32),          # beta
        0.2 * jax.random.normal(next(keys), (dn,), jnp.float32),          # run mean
        jax.random.uniform(next(keys), (dn,), jnp.float32, 0.5, 1.5),     # run var
    )

    emb_dim = sum(nf for _, nf in emb_sizes)
    fan_in = emb_dim + dn
    hidden = []
    for h in layers:
        bound = 1.0 / math.sqrt(fan_in)
        w = jax.random.uniform(next(keys), (fan_in, h), jnp.float32, -bound, bound)
        b = jax.random.uniform(next(keys), (h,), jnp.float32, -bound, bound)
        gamma = 1.0 + 0.1 * jax.random.normal(next(keys), (h,), jnp.float32)
        beta = 0.1 * jax.random.normal(next(keys), (h,), jnp.float32)
        mean = 0.2 * jax.random.normal(next(keys), (h,), jnp.float32)
        var = jax.random.uniform(next(keys), (h,), jnp.float32, 0.5, 1.5)
        hidden.append((w, b, gamma, beta, mean, var))
        fan_in = h

    bound = 1.0 / math.sqrt(fan_in)
    w_out = jax.random.uniform(next(keys), (fan_in, num_labels), jnp.float32,
                               -bound, bound)
    b_out = jax.random.uniform(next(keys), (num_labels,), jnp.float32,
                               -bound, bound)

    return {"emb_tables": emb_tables, "bn_num": bn_num,
            "hidden": hidden, "out": (w_out, b_out)}


def fold_params(raw, eps=1e-5):
    """Fold eval-mode BN affines + embedding tables into the Linear weights."""
    emb_tables = raw["emb_tables"]
    g_n, be_n, mu_n, va_n = raw["bn_num"]
    hidden = raw["hidden"]
    w_out, b_out = raw["out"]

    def bn_affine(g, b, mu, va):
        s = g / jnp.sqrt(va + eps)
        return s, b - mu * s

    # input BN (numerical slice only; embedding slice is identity)
    num_scale, num_shift = bn_affine(g_n, be_n, mu_n, va_n)

    emb_dims = [int(t.shape[1]) for t in emb_tables]
    emb_dim_total = sum(emb_dims)

    w1, b1, g1, be1, mu1, va1 = hidden[0]
    w1_cat = w1[:emb_dim_total]
    w1_num = w1[emb_dim_total:]

    # pre-multiply each embedding table by its slice of W1 -> one stacked table
    blocks, cat_offsets, off, total = [], [], 0, 0
    for tbl, f in zip(emb_tables, emb_dims):
        blocks.append(tbl @ w1_cat[off:off + f])
        off += f
        cat_offsets.append(total)
        total += int(tbl.shape[0])
    wc1 = jnp.concatenate(blocks, axis=0)                      # (total_cats, H1)
    wn1 = num_scale[:, None] * w1_num                          # (D_num, H1)
    b1_eff = (b1 + num_shift @ w1_num).reshape(1, -1)

    # fold each hidden layer's post-ReLU BN into the NEXT linear
    prev_s, prev_t = bn_affine(g1, be1, mu1, va1)
    extra = []
    for (w, b, g, be, mu, va) in hidden[1:]:
        w_eff = prev_s[:, None] * w
        b_eff = (b + prev_t @ w).reshape(1, -1)
        extra.append((w_eff, b_eff))
        prev_s, prev_t = bn_affine(g, be, mu, va)

    w_out_eff = prev_s[:, None] * w_out
    b_out_eff = (b_out + prev_t @ w_out).reshape(1, -1)

    return (wc1, wn1, b1_eff, extra, w_out_eff, b_out_eff,
            tuple(cat_offsets), total)


# ---------------------------------------------------------------------------
# Pure-JAX reference on the RAW (unfolded) parameters, for correctness
# ---------------------------------------------------------------------------
def l2d_forward_ref(x_categorical, x_numerical, raw, eps=1e-5):
    emb_tables = raw["emb_tables"]
    g_n, be_n, mu_n, va_n = raw["bn_num"]
    embs = [jnp.take(t, x_categorical[:, i], axis=0)
            for i, t in enumerate(emb_tables)]
    cat = jnp.concatenate(embs, axis=1)                    # dropout = identity
    num = (x_numerical - mu_n) / jnp.sqrt(va_n + eps) * g_n + be_n
    h = jnp.concatenate([cat, num], axis=1)
    for (w, b, g, be, mu, va) in raw["hidden"]:
        a = jnp.maximum(h @ w + b, 0.0)
        h = (a - mu) / jnp.sqrt(va + eps) * g + be         # dropout = identity
    w_out, b_out = raw["out"]
    logits = h @ w_out + b_out
    return jax.nn.log_softmax(logits, axis=1)


if __name__ == "__main__":
    # Small, module-consistent shapes:
    #   3 categorical columns with |cat| = [6, 9, 4] -> embed dims [3, 5, 2]
    #   6 numerical columns -> concatenated input = 10 + 6 = 16
    #   cfg.layers = [32, 16]; len(Label) = 2
    batch = 8
    cat_col_sizes = [6, 9, 4]
    num_numerical_cols = 6
    layers = [32, 16]
    num_labels = 2

    root = jax.random.PRNGKey(0)
    k_params, k_cat, k_num = jax.random.split(root, 3)

    raw = init_raw_params(k_params, cat_col_sizes, num_numerical_cols,
                          layers, num_labels)
    folded = fold_params(raw)

    x_categorical = jnp.stack(
        [jax.random.randint(jax.random.fold_in(k_cat, i), (batch,), 0, n)
         for i, n in enumerate(cat_col_sizes)], axis=1).astype(jnp.int32)
    x_numerical = jax.random.normal(k_num, (batch, num_numerical_cols),
                                    dtype=jnp.float32)

    out = l2d_forward_pallas(x_categorical, x_numerical, folded)
    out = jax.block_until_ready(out)

    ref = l2d_forward_ref(x_categorical, x_numerical, raw)
    assert out.shape == (batch, num_labels)
    assert jnp.allclose(out, ref, atol=1e-4, rtol=1e-4)

    print("KERNEL_OK")
</pallas_src>

<mosaic_0001>
module attributes {stable_mosaic.version = 11 : i64} {
  func.func @kernel(%arg0: i32, %arg1: memref<8x3xi32, #tpu.memory_space<vmem>>, %arg2: memref<8x6xf32, #tpu.memory_space<vmem>>, %arg3: memref<19x32xf32, #tpu.memory_space<vmem>>, %arg4: memref<6x32xf32, #tpu.memory_space<vmem>>, %arg5: memref<1x32xf32, #tpu.memory_space<vmem>>, %arg6: memref<32x16xf32, #tpu.memory_space<vmem>>, %arg7: memref<1x16xf32, #tpu.memory_space<vmem>>, %arg8: memref<16x2xf32, #tpu.memory_space<vmem>>, %arg9: memref<1x2xf32, #tpu.memory_space<vmem>>, %arg10: memref<8x2xf32, #tpu.memory_space<vmem>>) attributes {dimension_semantics = [#tpu.dimension_semantics<parallel>], iteration_bounds = array<i64: 1>, scalar_prefetch = 0 : i64, scratch_operands = 0 : i64, tpu.core_type = #tpu.core_type<tc>, window_params = [{transform_indices = @transform_0, window_bounds = array<i64: 8, 3>}, {transform_indices = @transform_1, window_bounds = array<i64: 8, 6>}, {pipeline_mode = #tpu.pipeline_mode<synchronous>, transform_indices = @transform_2, window_bounds = array<i64: 19, 32>}, {pipeline_mode = #tpu.pipeline_mode<synchronous>, transform_indices = @transform_3, window_bounds = array<i64: 6, 32>}, {pipeline_mode = #tpu.pipeline_mode<synchronous>, transform_indices = @transform_4, window_bounds = array<i64: 1, 32>}, {pipeline_mode = #tpu.pipeline_mode<synchronous>, transform_indices = @transform_5, window_bounds = array<i64: 32, 16>}, {pipeline_mode = #tpu.pipeline_mode<synchronous>, transform_indices = @transform_6, window_bounds = array<i64: 1, 16>}, {pipeline_mode = #tpu.pipeline_mode<synchronous>, transform_indices = @transform_7, window_bounds = array<i64: 16, 2>}, {pipeline_mode = #tpu.pipeline_mode<synchronous>, transform_indices = @transform_8, window_bounds = array<i64: 1, 2>}, {transform_indices = @transform_9, window_bounds = array<i64: 8, 2>}]} {
    %c0 = arith.constant 0 : index
    %c0_0 = arith.constant 0 : index
    %0 = vector.load %arg1[%c0, %c0_0] : memref<8x3xi32, #tpu.memory_space<vmem>>, vector<8x3xi32>
    %1 = tpu.iota {dimensions = array<i32: 1>} : vector<8x19xi32>
    %cst = arith.constant 0.000000e+00 : f32
    %2 = vector.broadcast %cst : f32 to vector<8x19xf32>
    %3 = vector.extract_strided_slice %0 {offsets = [0, 0], sizes = [8, 1], strides = [1, 1]} : vector<8x3xi32> to vector<8x1xi32>
    %c0_i32 = arith.constant 0 : i32
    %4 = vector.broadcast %c0_i32 : i32 to vector<8x1xi32>
    %5 = arith.addi %3, %4 : vector<8x1xi32>
    %6 = vector.broadcast %5 : vector<8x1xi32> to vector<8x19xi32>
    %7 = arith.cmpi eq, %1, %6 : vector<8x19xi32>
    %8 = arith.extui %7 : vector<8x19xi1> to vector<8x19xi32>
    %9 = arith.sitofp %8 : vector<8x19xi32> to vector<8x19xf32>
    %10 = arith.addf %2, %9 : vector<8x19xf32>
    %11 = vector.extract_strided_slice %0 {offsets = [0, 1], sizes = [8, 1], strides = [1, 1]} : vector<8x3xi32> to vector<8x1xi32>
    %c6_i32 = arith.constant 6 : i32
    %12 = vector.broadcast %c6_i32 : i32 to vector<8x1xi32>
    %13 = arith.addi %11, %12 : vector<8x1xi32>
    %14 = vector.broadcast %13 : vector<8x1xi32> to vector<8x19xi32>
    %15 = arith.cmpi eq, %1, %14 : vector<8x19xi32>
    %16 = arith.extui %15 : vector<8x19xi1> to vector<8x19xi32>
    %17 = arith.sitofp %16 : vector<8x19xi32> to vector<8x19xf32>
    %18 = arith.addf %10, %17 : vector<8x19xf32>
    %19 = vector.extract_strided_slice %0 {offsets = [0, 2], sizes = [8, 1], strides = [1, 1]} : vector<8x3xi32> to vector<8x1xi32>
    %c15_i32 = arith.constant 15 : i32
    %20 = vector.broadcast %c15_i32 : i32 to vector<8x1xi32>
    %21 = arith.addi %19, %20 : vector<8x1xi32>
    %22 = vector.broadcast %21 : vector<8x1xi32> to vector<8x19xi32>
    %23 = arith.cmpi eq, %1, %22 : vector<8x19xi32>
    %24 = arith.extui %23 : vector<8x19xi1> to vector<8x19xi32>
    %25 = arith.sitofp %24 : vector<8x19xi32> to vector<8x19xf32>
    %26 = arith.addf %18, %25 : vector<8x19xf32>
    %c0_1 = arith.constant 0 : index
    %c0_2 = arith.constant 0 : index
    %27 = vector.load %arg3[%c0_1, %c0_2] : memref<19x32xf32, #tpu.memory_space<vmem>>, vector<19x32xf32>
    %cst_3 = arith.constant dense<0.000000e+00> : vector<8x32xf32>
    %28 = tpu.matmul %26, %27, %cst_3 {dimension_numbers = #tpu.dot_dimension_numbers<[1], [0], [0], [1], [0, 0, 1, 1], [], []>} : vector<8x19xf32>, vector<19x32xf32>, vector<8x32xf32> -> vector<8x32xf32>
    %c0_4 = arith.constant 0 : index
    %c0_5 = arith.constant 0 : index
    %29 = vector.load %arg2[%c0_4, %c0_5] : memref<8x6xf32, #tpu.memory_space<vmem>>, vector<8x6xf32>
    %c0_6 = arith.constant 0 : index
    %c0_7 = arith.constant 0 : index
    %30 = vector.load %arg4[%c0_6, %c0_7] : memref<6x32xf32, #tpu.memory_space<vmem>>, vector<6x32xf32>
    %cst_8 = arith.constant dense<0.000000e+00> : vector<8x32xf32>
    %31 = tpu.matmul %29, %30, %cst_8 {dimension_numbers = #tpu.dot_dimension_numbers<[1], [0], [0], [1], [0, 0, 1, 1], [], []>} : vector<8x6xf32>, vector<6x32xf32>, vector<8x32xf32> -> vector<8x32xf32>
    %32 = arith.addf %28, %31 : vector<8x32xf32>
    %c0_9 = arith.constant 0 : index
    %c0_10 = arith.constant 0 : index
    %33 = vector.load %arg5[%c0_9, %c0_10] : memref<1x32xf32, #tpu.memory_space<vmem>>, vector<1x32xf32>
    %34 = vector.broadcast %33 : vector<1x32xf32> to vector<8x32xf32>
    %35 = arith.addf %32, %34 : vector<8x32xf32>
    %cst_11 = arith.constant 0.000000e+00 : f32
    %36 = vector.broadcast %cst_11 : f32 to vector<8x32xf32>
    %37 = arith.maximumf %35, %36 : vector<8x32xf32>
    %c0_12 = arith.constant 0 : index
    %c0_13 = arith.constant 0 : index
    %38 = vector.load %arg6[%c0_12, %c0_13] : memref<32x16xf32, #tpu.memory_space<vmem>>, vector<32x16xf32>
    %cst_14 = arith.constant dense<0.000000e+00> : vector<8x16xf32>
    %39 = tpu.matmul %37, %38, %cst_14 {dimension_numbers = #tpu.dot_dimension_numbers<[1], [0], [0], [1], [0, 0, 1, 1], [], []>} : vector<8x32xf32>, vector<32x16xf32>, vector<8x16xf32> -> vector<8x16xf32>
    %c0_15 = arith.constant 0 : index
    %c0_16 = arith.constant 0 : index
    %40 = vector.load %arg7[%c0_15, %c0_16] : memref<1x16xf32, #tpu.memory_space<vmem>>, vector<1x16xf32>
    %41 = vector.broadcast %40 : vector<1x16xf32> to vector<8x16xf32>
    %42 = arith.addf %39, %41 : vector<8x16xf32>
    %cst_17 = arith.constant 0.000000e+00 : f32
    %43 = vector.broadcast %cst_17 : f32 to vector<8x16xf32>
    %44 = arith.maximumf %42, %43 : vector<8x16xf32>
    %c0_18 = arith.constant 0 : index
    %c0_19 = arith.constant 0 : index
    %45 = vector.load %arg8[%c0_18, %c0_19] : memref<16x2xf32, #tpu.memory_space<vmem>>, vector<16x2xf32>
    %cst_20 = arith.constant dense<0.000000e+00> : vector<8x2xf32>
    %46 = tpu.matmul %44, %45, %cst_20 {dimension_numbers = #tpu.dot_dimension_numbers<[1], [0], [0], [1], [0, 0, 1, 1], [], []>} : vector<8x16xf32>, vector<16x2xf32>, vector<8x2xf32> -> vector<8x2xf32>
    %c0_21 = arith.constant 0 : index
    %c0_22 = arith.constant 0 : index
    %47 = vector.load %arg9[%c0_21, %c0_22] : memref<1x2xf32, #tpu.memory_space<vmem>>, vector<1x2xf32>
    %48 = vector.broadcast %47 : vector<1x2xf32> to vector<8x2xf32>
    %49 = arith.addf %46, %48 : vector<8x2xf32>
    %cst_23 = arith.constant dense<0xFF800000> : vector<8xf32>
    %50 = vector.multi_reduction <maximumf>, %49, %cst_23 [1] : vector<8x2xf32> to vector<8xf32>
    %51 = vector.shape_cast %50 : vector<8xf32> to vector<8x1xf32>
    %52 = vector.broadcast %51 : vector<8x1xf32> to vector<8x2xf32>
    %53 = arith.subf %49, %52 : vector<8x2xf32>
    %54 = math.exp %53 : vector<8x2xf32>
    %cst_24 = arith.constant dense<0.000000e+00> : vector<8xf32>
    %55 = vector.multi_reduction <add>, %54, %cst_24 [1] : vector<8x2xf32> to vector<8xf32>
    %56 = vector.shape_cast %55 : vector<8xf32> to vector<8x1xf32>
    %57 = math.log %56 : vector<8x1xf32>
    %58 = vector.broadcast %57 : vector<8x1xf32> to vector<8x2xf32>
    %59 = arith.subf %53, %58 : vector<8x2xf32>
    %c0_25 = arith.constant 0 : index
    %c0_26 = arith.constant 0 : index
    %60 = vector.load %arg10[%c0_25, %c0_26] : memref<8x2xf32, #tpu.memory_space<vmem>>, vector<8x2xf32>
    tpu.vector_store %arg10[%c0_25, %c0_26], %59 {strides = array<i32>} : memref<8x2xf32, #tpu.memory_space<vmem>>, vector<8x2xf32>,
    return
  }
  func.func @transform_0(%arg0: i32) -> (i32, i32) {
    %c0_i32 = arith.constant 0 : i32
    %c0_i32_0 = arith.constant 0 : i32
    return %arg0, %c0_i32 : i32, i32
  }
  func.func @transform_1(%arg0: i32) -> (i32, i32) {
    %c0_i32 = arith.constant 0 : i32
    %c0_i32_0 = arith.constant 0 : i32
    return %arg0, %c0_i32 : i32, i32
  }
  func.func @transform_2(%arg0: i32) -> (i32, i32) {
    %c0_i32 = arith.constant 0 : i32
    %c0_i32_0 = arith.constant 0 : i32
    %c0_i32_1 = arith.constant 0 : i32
    return %c0_i32, %c0_i32_0 : i32, i32
  }
  func.func @transform_3(%arg0: i32) -> (i32, i32) {
    %c0_i32 = arith.constant 0 : i32
    %c0_i32_0 = arith.constant 0 : i32
    %c0_i32_1 = arith.constant 0 : i32
    return %c0_i32, %c0_i32_0 : i32, i32
  }
  func.func @transform_4(%arg0: i32) -> (i32, i32) {
    %c0_i32 = arith.constant 0 : i32
    %c0_i32_0 = arith.constant 0 : i32
    %c0_i32_1 = arith.constant 0 : i32
    return %c0_i32, %c0_i32_0 : i32, i32
  }
  func.func @transform_5(%arg0: i32) -> (i32, i32) {
    %c0_i32 = arith.constant 0 : i32
    %c0_i32_0 = arith.constant 0 : i32
    %c0_i32_1 = arith.constant 0 : i32
    return %c0_i32, %c0_i32_0 : i32, i32
  }
  func.func @transform_6(%arg0: i32) -> (i32, i32) {
    %c0_i32 = arith.constant 0 : i32
    %c0_i32_0 = arith.constant 0 : i32
    %c0_i32_1 = arith.constant 0 : i32
    return %c0_i32, %c0_i32_0 : i32, i32
  }
  func.func @transform_7(%arg0: i32) -> (i32, i32) {
    %c0_i32 = arith.constant 0 : i32
    %c0_i32_0 = arith.constant 0 : i32
    %c0_i32_1 = arith.constant 0 : i32
    return %c0_i32, %c0_i32_0 : i32, i32
  }
  func.func @transform_8(%arg0: i32) -> (i32, i32) {
    %c0_i32 = arith.constant 0 : i32
    %c0_i32_0 = arith.constant 0 : i32
    %c0_i32_1 = arith.constant 0 : i32
    return %c0_i32, %c0_i32_0 : i32, i32
  }
  func.func @transform_9(%arg0: i32) -> (i32, i32) {
    %c0_i32 = arith.constant 0 : i32
    %c0_i32_0 = arith.constant 0 : i32
    return %arg0, %c0_i32 : i32, i32
  }
}

</mosaic_0001>

<bundles_post_ra>
// kernel: tpu_custom_call.1
= control target key start
LH: loop header
LB: loop body
LE: loop exit
PB: predicated region body
PF: predicated region fallthrough
CT: control target
= control target key end

     0   :  { %v486_v0 = vmov 0   ;;  %v487_v2 = vmov 2   ;;  %v488_v4 = vmov 0.0   ;;  %vm145_vm0 = vcmask 1042432   ;;  %s613_s0 = inlined_call_operand.vmem [shape: s32[8,3], index: 0, kind: input, shape index: {}]   ;;  %s614_s2 = inlined_call_operand.vmem [shape: f32[19,32], index: 2, kind: input, shape index: {}]   ;;  %s615_s3 = inlined_call_operand.vmem [shape: f32[6,32], index: 3, kind: input, shape index: {}]   ;;  %s616_s1 = inlined_call_operand.vmem [shape: f32[8,6], index: 1, kind: input, shape index: {}]   ;;  %s617_s5 = inlined_call_operand.vmem [shape: f32[32,16], index: 5, kind: input, shape index: {}]   ;;  %s618_s4 = inlined_call_operand.vmem [shape: f32[1,32], index: 4, kind: input, shape index: {}]   ;;  %s619_s7 = inlined_call_operand.vmem [shape: f32[16,2], index: 7, kind: input, shape index: {}]   ;;  %s620_s6 = inlined_call_operand.vmem [shape: f32[1,16], index: 6, kind: input, shape index: {}]   ;;  %s621_s8 = inlined_call_operand.vmem [shape: f32[1,2], index: 8, kind: input, shape index: {}]   ;;  %s622_s9 = inlined_call_operand.vmem [shape: f32[8,2], index: 9, kind: output, shape index: {}]  }
   0x1   :  { %478 = vset.pattern.permute.xlu0 %v486_v0  ;;  %v32_v1 = vld [vmem:[%s613_s0] sm:$0xff]  ;;  %480 = vset.pattern.permute.xlu1 %v487_v2  ;;  %v60_v6 = vld [vmem:[%s614_s2 + $0x10] sm:$0x7]  ;;  %vm67_vm1 = vcmask 1045504   ;;  %v59_v8 = vld [vmem:[%s614_s2 + $0x8] sm:$0xff]  ;;  %v489_v9 = vmov 1   ;;  %v33_v12 = vlaneseq }
   0x2   :  { %36 = vperm.xlu0 %478, %v32_v1   ;;  %v50_v3 = vadd.s32 15, %v32_v1  ;;  %446 = vmatprep.subr.mxu1 %v488_v4  ;;  %v42_v5 = vadd.s32 6, %v32_v1  ;;  %v62_v7 = vld [vmem:[%s615_s3] sm:$0x3f]  ;;  %vm63_vm2 = vcmask 48128   ;;  %vm490_vm3 = vmmov 0  }
   0x3   :  { %441 = vmatprep.subr.mxu0 %v488_v4  ;;  %447 = vmatpush3.msk.msra.mxu1 %vm145_vm0, %v60_v6  ;;  %v61_v10 = vld [vmem:[%s616_s1] sm:$0xff]  ;;  %v34_v13 = vand.u32 127, %v33_v12  ;;  %vm141_vm7 = vcmask 154624   ;;  %v231_v23 = vld [vmem:[%s617_s5 + $0x18] sm:$0xff]  ;;  %v230_v25 = vld [vmem:[%s617_s5 + $0x10] sm:$0xff]  ;;  %vm239_vm8 = vcmask 261120  }
   0x4   :  { %52 = vperm.xlu1 %480, %v50_v3   ;;  %448 = vmatprep.subr.mxu1 %v488_v4  ;;  %v58_v11 = vld [vmem:[%s614_s2] sm:$0xff]  ;;  %v229_v26 = vld [vmem:[%s617_s5 + $0x8] sm:$0xff]  ;;  %vm323_vm9 = vcmask 130048   ;;  %vm397_vm10 = vcmask 15360  }
   0x5   :  { %442 = vmatpush3.msk.msra.mxu0 %vm67_vm1, %v62_v7  ;;  %443 = vmatprep.mubr.msk.f32.mxu0 %vm490_vm3, %v488_v4  ;;  %v228_v27 = vld [vmem:[%s617_s5] sm:$0xff]  ;;  %v315_v34 = vld [vmem:[%s619_s7 + $0x8] sm:$0xff] }
   0x6   :  { %479 = vset.pattern.permute.xlu0 %v489_v9  ;;  %449 = vmatpush3.msra.mxu1 %v59_v8  ;;  %v422_v29 = vld [vmem:[%s618_s4] ss:$0 sm:$0xff] }
   0x7   :  { %44 = vperm.xlu0 %479, %v42_v5   ;;  %444 = vmatmul.mubr.msk.f32.vlgmr.msra.gmra.mxu0 %vm63_vm2, %v61_v10  ;;  %v314_v35 = vld [vmem:[%s619_s7] sm:$0xff] }
   0x8   :  { %450 = vmatprep.subr.mxu1 %v488_v4  ;;  %452 = vmatprep.mubr.msk.f32.mxu1 %vm490_vm3, %v488_v4  ;;  %v423_v36 = vld [vmem:[%s620_s6] ss:$0 sm:$0xff] }
   0x9   :  { %451 = vmatpush3.msra.mxu1 %v58_v11  ;;  %455 = vmatprep.subr.mxu0 %v488_v4  ;;  %v425_v41 = vld [vmem:[%s621_s8] ss:$0 sm:$0xff] }
   0xa   :  { %463 = vmatprep.mubr.msk.f32.mxu0 %vm490_vm3, %v488_v4  ;;  %466 = vmatprep.subr.mxu1 %v488_v4 }
   0xb   :  { %481 = vset.pattern.permute.xlu0 %v487_v2  ;;  %456 = vmatpush3.msra.mxu0 %v231_v23 }
   0xc   :  { %457 = vmatprep.subr.mxu0 %v488_v4 }
   0xd   :  { %458 = vmatpush3.msra.mxu0 %v230_v25 }
   0xe   :  { %459 = vmatprep.subr.mxu0 %v488_v4 }
   0xf   :  { %460 = vmatpush3.msra.mxu0 %v229_v26 }
  0x10   :  { %461 = vmatprep.subr.mxu0 %v488_v4 }
  0x11   :  { %462 = vmatpush3.msra.mxu0 %v228_v27 }
  0x7d   :  { %v37_v14 = vpop.permute.xlu0 %36 }
  0x7e   :  { %vm38_vm4 = vcmp.eq.s32.totalorder %v34_v13, %v37_v14 }
  0x7f   :  { %v53_v15 = vpop.permute.xlu1 %52  ;;  %v415_v17 = vsel %vm38_vm4, 1.0, %v488_v4 }
  0x80   :  { %vm54_vm5 = vcmp.eq.s32.totalorder %v34_v13, %v53_v15 }
  0x81   :  { %v417_v19 = vsel %vm54_vm5, 1.0, %v488_v4 }
  0x82   :  { %v45_v16 = vpop.permute.xlu0 %44 }
  0x83   :  { %vm46_vm6 = vcmp.eq.s32.totalorder %v34_v13, %v45_v16 }
  0x84   :  { %v416_v18 = vsel %vm46_vm6, 1.0, %v488_v4 }
  0x85   :  { %v49_v20 = vadd.f32 %v416_v18, %v415_v17 }
  0x87   :  { %v57_v21 = vadd.f32 %v417_v19, %v49_v20 }
  0x89   :  { %453 = vmatmul.mubr.msk.f32.vlgmr.msra.gmra.mxu1 %vm141_vm7, %v57_v21 }
  0x8a   :  { %470 = vmatprep.mubr.msk.f32.mxu1 %vm490_vm3, %v488_v4  ;;  %467 = vmatpush3.msra.mxu1 %v315_v34 }
  0x8b   :  { %468 = vmatprep.subr.mxu1 %v488_v4 }
  0x8c   :  { %469 = vmatpush3.msra.mxu1 %v314_v35 }
  0xc7   :  { %v137_v22 = vpop.f32.mrf.mxu0 }
  0xc9   :  { %v445_v24 = vpop.f32.mrf.mxu0 }
 0x149   :  { %v215_v28 = vpop.f32.mrf.mxu1 }
 0x14a   :  { %v216_v30 = vadd.f32 %v215_v28, %v137_v22 }
 0x14b   :  { %v454_v31 = vpop.f32.mrf.mxu1 }
 0x14c   :  { %v226_v32 = vadd.f32 %v422_v29, %v216_v30 }
 0x14e   :  { %v227_v33 = vmax.f32 %v226_v32, 0.0 }
 0x150   :  { %464 = vmatmul.mubr.msk.f32.vlgmr.msra.gmra.mxu0 %vm239_vm8, %v227_v33 }
 0x210   :  { %v309_v37 = vpop.f32.mrf.mxu0 }
 0x211   :  { %v310_v38 = vadd.f32 %v423_v36, %v309_v37 }
 0x212   :  { %v465_v39 = vpop.f32.mrf.mxu0 }
 0x213   :  { %v313_v40 = vmax.f32 %v310_v38, 0.0 }
 0x215   :  { %471 = vmatmul.mubr.msk.f32.vlgmr.msra.gmra.mxu1 %vm323_vm9, %v313_v40 }
 0x2d5   :  { %v393_v42 = vpop.f32.mrf.mxu1 }
 0x2d6   :  { %v394_v43 = vadd.f32 %v425_v41, %v393_v42 }
 0x2d7   :  { %v472_v44 = vpop.f32.mrf.mxu1 }
 0x2d8   :  { %v398_v45 = vsel %vm397_vm10, %v394_v43, -inf }
 0x2d9   :  { %399 = vmax.xlane.f32.xlu1 %v398_v45 }
 0x362   :  { %v400_v46 = vpop.xlane.xlu1 %399 }
 0x363   :  { %v401_v47 = vsub.f32 %v394_v43, %v400_v46 }
 0x365   :  { %v402_v48 = vmul.f32 1.442695, %v401_v47 }
 0x367   :  { %482 = vpow2.f32 %v402_v48 }
 0x374   :  { %v483_v49 = vpop.eup %482 }
 0x375   :  { %v404_v50 = vsel %vm397_vm10, %v483_v49, 0.0 }
 0x376   :  { %405 = vadd.xlane.f32.xlu0 %v404_v50 }
 0x3ff   :  { %v406_v51 = vpop.xlane.xlu0 %405 }
 0x400   :  { %484 = vlog2.f32 %v406_v51 }
 0x40d   :  { %v485_v52 = vpop.eup %484 }
 0x40e   :  { %v408_v53 = vmul.f32 0.6931472, %v485_v52 }
 0x410   :  { %v409_v54 = vsub.f32 %v401_v47, %v408_v53 }
 0x412   :  { %410 = vst.msk [vmem:[%s622_s9] sm:$0xff] %vm397_vm10, %v409_v54 }

</bundles_post_ra>
